<compile_context>
chip_gen: v7x
topology: tpu7x:2x2x1
jax: 0.10.0
libtpu: 0.0.40
codegen_flags: <defaults>
</compile_context>

<pallas_src>
import jax
import jax.numpy as jnp
from jax import lax
from jax.experimental import pallas as pl
from jax.experimental.pallas import tpu as pltpu

# Older JAX releases used a different name for the Mosaic params dataclass.
_CompilerParams = getattr(pltpu, "CompilerParams", None)
if _CompilerParams is None:  # pragma: no cover
    _CompilerParams = getattr(pltpu, "TPUCompilerParams")


def _mosaic(dims, vmem_limit):
    return _CompilerParams(dimension_semantics=dims, vmem_limit_bytes=vmem_limit)


def _round_up(x, m):
    return ((x + m - 1) // m) * m


def _pick_tile(n, max_tile, align):
    """Return (tile, padded_n) with tile % align == 0 and padded_n % tile == 0."""
    n_al = _round_up(max(int(n), 1), align)
    if n_al <= max_tile:
        return n_al, n_al
    tile = (max_tile // align) * align
    return tile, _round_up(n_al, tile)


def _hw_config():
    """Per-generation tiling / VMEM budget (v5e/v6e: 128 MiB VMEM, v7x: 64 MiB)."""
    vmem_bytes = 64 * 1024 * 1024
    try:
        vmem_bytes = int(pltpu.get_tpu_info().vmem_capacity_bytes)
    except Exception:
        pass
    if vmem_bytes >= 96 * 1024 * 1024:  # v5e / v6e
        return {"tm": 512, "tk": 512, "vmem_limit": 64 * 1024 * 1024}
    # v7x: half the row-tile footprint, tighter explicit limit
    return {"tm": 256, "tk": 512, "vmem_limit": 32 * 1024 * 1024}


def _pad2(x, rows, cols):
    return jnp.pad(x, ((0, rows - x.shape[0]), (0, cols - x.shape[1])))


# ----------------------------- Pallas kernels ------------------------------ #

def _linear_kernel(x_ref, wT_ref, b_ref, o_ref, acc_ref):
    """o = x @ wT + b, tiled over (row tiles, K tiles) with f32 accumulation."""
    k = pl.program_id(1)

    @pl.when(k == 0)
    def _():
        acc_ref[...] = jnp.zeros_like(acc_ref)

    acc_ref[...] += jnp.dot(x_ref[...], wT_ref[...],
                            preferred_element_type=jnp.float32)

    @pl.when(k == pl.num_programs(1) - 1)
    def _():
        o_ref[...] = (acc_ref[...] + b_ref[...]).astype(o_ref.dtype)


def _linear(x, wT, b, out_dtype, tm, tk, vmem_limit):
    m, kdim = x.shape
    nf = wT.shape[1]
    return pl.pallas_call(
        _linear_kernel,
        out_shape=jax.ShapeDtypeStruct((m, nf), out_dtype),
        grid=(m // tm, kdim // tk),
        in_specs=[
            pl.BlockSpec((tm, tk), lambda i, k: (i, k)),
            pl.BlockSpec((tk, nf), lambda i, k: (k, 0)),
            pl.BlockSpec((1, nf), lambda i, k: (0, 0)),
        ],
        out_specs=pl.BlockSpec((tm, nf), lambda i, k: (i, 0)),
        scratch_shapes=[pltpu.VMEM((tm, nf), jnp.float32)],
        compiler_params=_mosaic(("parallel", "arbitrary"), vmem_limit),
    )(x, wT, b)


def _make_agg_kernel(tm, f_pad, n_valid, fuse_root):
    """Aggregation kernel factory.

    out[i] = root[i] + sum_t sum_k adj[t, i, k] @ h[t, k]      (HeteroConv 'sum')
    where root is either computed in-kernel (x_dst @ WrT + b, fuse_root=True) or
    passed pre-computed.  BatchNorm batch statistics (masked column sum / sumsq)
    are accumulated at each row tile's finalize step into VMEM-resident outputs.
    """

    def _stats_init(sum_ref, sq_ref):
        sum_ref[...] = jnp.zeros_like(sum_ref)
        sq_ref[...] = jnp.zeros_like(sq_ref)

    def _finalize(i, o_ref, sum_ref, sq_ref, acc_ref):
        acc = acc_ref[...]
        o_ref[...] = acc
        rows = lax.broadcasted_iota(jnp.int32, (tm, f_pad), 0) + i * tm
        valid = jnp.where(rows < n_valid, acc, 0.0)
        sum_ref[...] += jnp.sum(valid, axis=0, keepdims=True)
        sq_ref[...] += jnp.sum(valid * valid, axis=0, keepdims=True)

    if fuse_root:
        def kernel(adj_ref, h_ref, xd_ref, wrT_ref, b_ref,
                   o_ref, sum_ref, sq_ref, acc_ref):
            i, t, k = pl.program_id(0), pl.program_id(1), pl.program_id(2)
            last_tk = ((t == pl.num_programs(1) - 1) &
                       (k == pl.num_programs(2) - 1))

            @pl.when((i == 0) & (t == 0) & (k == 0))
            def _():
                _stats_init(sum_ref, sq_ref)

            @pl.when((t == 0) & (k == 0))
            def _():
                acc_ref[...] = (jnp.dot(xd_ref[...], wrT_ref[...],
                                        preferred_element_type=jnp.float32)
                                + b_ref[...])

            acc_ref[...] += jnp.dot(adj_ref[...], h_ref[...],
                                    preferred_element_type=jnp.float32)

            @pl.when(last_tk)
            def _():
                _finalize(i, o_ref, sum_ref, sq_ref, acc_ref)
    else:
        def kernel(adj_ref, h_ref, root_ref,
                   o_ref, sum_ref, sq_ref, acc_ref):
            i, t, k = pl.program_id(0), pl.program_id(1), pl.program_id(2)
            last_tk = ((t == pl.num_programs(1) - 1) &
                       (k == pl.num_programs(2) - 1))

            @pl.when((i == 0) & (t == 0) & (k == 0))
            def _():
                _stats_init(sum_ref, sq_ref)

            @pl.when((t == 0) & (k == 0))
            def _():
                acc_ref[...] = root_ref[...]

            acc_ref[...] += jnp.dot(adj_ref[...], h_ref[...],
                                    preferred_element_type=jnp.float32)

            @pl.when(last_tk)
            def _():
                _finalize(i, o_ref, sum_ref, sq_ref, acc_ref)

    return kernel


def _hetero_aggregate(adj_stack, h_stack, root_args, *, n_valid, tm, tk,
                      vmem_limit, fuse_root):
    n_et, n_dst_pad, s_pad = adj_stack.shape
    f_pad = h_stack.shape[-1]
    kernel = _make_agg_kernel(tm, f_pad, n_valid, fuse_root)

    in_specs = [
        pl.BlockSpec((None, tm, tk), lambda i, t, k: (t, i, k)),
        pl.BlockSpec((None, tk, f_pad), lambda i, t, k: (t, k, 0)),
    ]
    if fuse_root:
        x_dst_p, wrT, b_sum = root_args
        d_dst_pad = x_dst_p.shape[1]
        in_specs += [
            pl.BlockSpec((tm, d_dst_pad), lambda i, t, k: (i, 0)),
            pl.BlockSpec((d_dst_pad, f_pad), lambda i, t, k: (0, 0)),
            pl.BlockSpec((1, f_pad), lambda i, t, k: (0, 0)),
        ]
        operands = (adj_stack, h_stack, x_dst_p, wrT, b_sum)
    else:
        (root,) = root_args
        in_specs += [pl.BlockSpec((tm, f_pad), lambda i, t, k: (i, 0))]
        operands = (adj_stack, h_stack, root)

    return pl.pallas_call(
        kernel,
        out_shape=(jax.ShapeDtypeStruct((n_dst_pad, f_pad), jnp.float32),
                   jax.ShapeDtypeStruct((1, f_pad), jnp.float32),
                   jax.ShapeDtypeStruct((1, f_pad), jnp.float32)),
        grid=(n_dst_pad // tm, n_et, s_pad // tk),
        in_specs=in_specs,
        out_specs=(pl.BlockSpec((tm, f_pad), lambda i, t, k: (i, 0)),
                   pl.BlockSpec((1, f_pad), lambda i, t, k: (0, 0)),
                   pl.BlockSpec((1, f_pad), lambda i, t, k: (0, 0))),
        scratch_shapes=[pltpu.VMEM((tm, f_pad), jnp.float32)],
        # Stats outputs accumulate across the row axis -> keep grid sequential.
        compiler_params=_mosaic(("arbitrary", "arbitrary", "arbitrary"), vmem_limit),
    )(*operands)


def _bn_apply(x, col_sum, col_sq, gamma, beta, n_valid, tm, vmem_limit, eps=1e-5):
    n_pad, nf = x.shape
    inv_n = 1.0 / float(n_valid)

    def kernel(x_ref, s_ref, q_ref, g_ref, b_ref, o_ref):
        mean = s_ref[...] * inv_n
        var = jnp.maximum(q_ref[...] * inv_n - mean * mean, 0.0)  # biased var
        inv = lax.rsqrt(var + eps)
        o_ref[...] = (x_ref[...] - mean) * inv * g_ref[...] + b_ref[...]

    return pl.pallas_call(
        kernel,
        out_shape=jax.ShapeDtypeStruct((n_pad, nf), jnp.float32),
        grid=(n_pad // tm,),
        in_specs=[
            pl.BlockSpec((tm, nf), lambda i: (i, 0)),
            pl.BlockSpec((1, nf), lambda i: (0, 0)),
            pl.BlockSpec((1, nf), lambda i: (0, 0)),
            pl.BlockSpec((1, nf), lambda i: (0, 0)),
            pl.BlockSpec((1, nf), lambda i: (0, 0)),
        ],
        out_specs=pl.BlockSpec((tm, nf), lambda i: (i, 0)),
        compiler_params=_mosaic(("parallel",), vmem_limit),
    )(x, col_sum, col_sq, gamma, beta)


# ------------------------------ Module wrapper ------------------------------ #

class HeteroGNNLayerPallas:
    """JAX/Pallas port of db_transformer.nn.hetero_gnn.HeteroGNNLayer."""

    def __init__(self, dim, out_dim, node_types, edge_types, aggr="sum",
                 batch_norm=True, key=jax.random.PRNGKey(0)):
        # TODO(synk): only aggr='sum' is implemented (mean/min/max/cat are not).
        assert aggr == "sum"
        self.node_types = list(node_types)
        self.edge_types = [tuple(et) for et in edge_types]
        self.out_dim = out_dim
        self.batch_norm = batch_norm
        self.hw = _hw_config()
        self.f_pad = _round_up(out_dim, 128)   # lane-dense output width

        def in_dim(nt):
            return dim[nt] if isinstance(dim, dict) else dim

        self.in_dim = {nt: in_dim(nt) for nt in node_types}
        tk_max = self.hw["tk"]

        self.w_l, self.w_r, self.bias = {}, {}, {}
        self.wlT_pad, self.src_kpad = {}, {}
        for et in self.edge_types:
            src_t, _, dst_t = et
            key, k1, k2 = jax.random.split(key, 3)
            d_src, d_dst = self.in_dim[src_t], self.in_dim[dst_t]
            w_l = jax.random.normal(k1, (out_dim, d_src), jnp.float32) / jnp.sqrt(d_src)
            w_r = jax.random.normal(k2, (out_dim, d_dst), jnp.float32) / jnp.sqrt(d_dst)
            b = jnp.zeros((1, out_dim), jnp.float32)
            self.w_l[et], self.w_r[et], self.bias[et] = w_l, w_r, b
            tk_src, d_src_pad = _pick_tile(d_src, tk_max, 128)
            self.src_kpad[et] = (tk_src, d_src_pad)
            # pre-transpose + pad + cast once -> no in-kernel .T relayout
            self.wlT_pad[et] = _pad2(w_l.T, d_src_pad, self.f_pad).astype(jnp.bfloat16)

        # BatchNorm affine params (learnable part is [:, :out_dim]).
        self.bn_gamma = {nt: jnp.ones((1, self.f_pad), jnp.float32) for nt in node_types}
        self.bn_beta = {nt: jnp.zeros((1, self.f_pad), jnp.float32) for nt in node_types}
        # TODO(synk): BatchNorm running_mean/running_var (eval mode) are not tracked.

    def __call__(self, x_dict, edge_index_dict):
        tm_max, tk_max, vmem = self.hw["tm"], self.hw["tk"], self.hw["vmem_limit"]
        f_pad = self.f_pad

        # Group provided edge types by dst node type (HeteroConv 'sum' across them).
        by_dst = {}
        for et in edge_index_dict:
            et = tuple(et)
            by_dst.setdefault(et[2], []).append(et)

        out = {}
        for dst_t, ets in by_dst.items():
            x_dst = x_dict[dst_t].astype(jnp.float32)
            n_dst, d_dst = x_dst.shape[0], self.in_dim[dst_t]
            tm, n_dst_pad = _pick_tile(n_dst, tm_max, 16)      # sublane-safe for bf16
            tk_dst, d_dst_pad = _pick_tile(d_dst, tk_max, 128)

            # Uniform padded src extent across edge types targeting dst_t.
            max_src = max(x_dict[et[0]].shape[0] for et in ets)
            tk_agg, s_pad = _pick_tile(max_src, tk_max, 128)

            zero_bias = jnp.zeros((1, f_pad), jnp.float32)
            adj_list, h_list = [], []
            for et in ets:
                src_t = et[0]
                x_src = x_dict[src_t].astype(jnp.float32)
                tk_src, d_src_pad = self.src_kpad[et]

                # lin_l first (sum aggregation is linear): big adj matmul has K = f_pad.
                # TODO(synk): for d_src < out_dim the (adj @ x_src) @ Wl^T ordering
                #             would be cheaper; only projection-first is implemented.
                x_src_p = _pad2(x_src, s_pad, d_src_pad).astype(jnp.bfloat16)
                h = _linear(x_src_p, self.wlT_pad[et], zero_bias, jnp.bfloat16,
                            tm=tk_agg, tk=tk_src, vmem_limit=vmem)
                h_list.append(h)

                # Dense adjacency (dst x src); multi-edges sum; exact in bf16 (<256).
                ei = edge_index_dict[et]
                adj = jnp.zeros((n_dst_pad, s_pad), jnp.float32)
                adj = adj.at[ei[1], ei[0]].add(1.0).astype(jnp.bfloat16)
                adj_list.append(adj)

            adj_stack = jnp.stack(adj_list, axis=0)   # [T, n_dst_pad, s_pad] bf16
            h_stack = jnp.stack(h_list, axis=0)       # [T, s_pad, f_pad]    bf16

            # Root term once per dst node type: x_dst @ (sum_t W_r_t)^T + sum_t b_t.
            wr_sum = sum(self.w_r[et] for et in ets)
            b_sum = _pad2(sum(self.bias[et] for et in ets), 1, f_pad)
            wr_sum_T = _pad2(wr_sum.T, d_dst_pad, f_pad).astype(jnp.bfloat16)
            x_dst_p = _pad2(x_dst, n_dst_pad, d_dst_pad).astype(jnp.bfloat16)

            # Fuse the root matmul into the aggregation kernel when the full-width
            # x_dst / Wr blocks comfortably fit VMEM; otherwise K-tile it separately.
            fuse_bytes = (tm * d_dst_pad + d_dst_pad * f_pad) * 2 * 2  # bf16, 2 bufs
            fuse_root = fuse_bytes <= vmem // 4

            if fuse_root:
                root_args = (x_dst_p, wr_sum_T, b_sum)
            else:
                root = _linear(x_dst_p, wr_sum_T, b_sum, jnp.float32,
                               tm=tm, tk=tk_dst, vmem_limit=vmem)
                root_args = (root,)

            agg, col_sum, col_sq = _hetero_aggregate(
                adj_stack, h_stack, root_args, n_valid=n_dst,
                tm=tm, tk=tk_agg, vmem_limit=vmem, fuse_root=fuse_root)

            if self.batch_norm:
                y = _bn_apply(agg, col_sum, col_sq, self.bn_gamma[dst_t],
                              self.bn_beta[dst_t], n_dst, tm, vmem)
            else:
                y = agg   # true pass-through when batch_norm=False
            out[dst_t] = y[:n_dst, :self.out_dim]
        return out


# --------------------------- Pure-JAX reference ----------------------------- #

def reference_forward(layer, x_dict, edge_index_dict):
    contributions = {}
    for et, ei in edge_index_dict.items():
        et = tuple(et)
        src_t, _, dst_t = et
        x_src = x_dict[src_t].astype(jnp.float32)
        x_dst = x_dict[dst_t].astype(jnp.float32)
        n_src, n_dst = x_src.shape[0], x_dst.shape[0]
        adj = jnp.zeros((n_dst, n_src), jnp.float32).at[ei[1], ei[0]].add(1.0)
        o = (adj @ x_src) @ layer.w_l[et].T + x_dst @ layer.w_r[et].T + layer.bias[et]
        contributions.setdefault(dst_t, []).append(o)
    out = {}
    for nt, outs in contributions.items():
        s = sum(outs)
        if layer.batch_norm:
            mean = jnp.mean(s, axis=0, keepdims=True)
            var = jnp.mean((s - mean) ** 2, axis=0, keepdims=True)
            s = (s - mean) * lax.rsqrt(var + 1e-5)   # gamma=1, beta=0
        out[nt] = s
    return out


# --------------------------------- Example ---------------------------------- #

if __name__ == "__main__":
    key = jax.random.PRNGKey(0)

    node_types = ["A", "B"]
    edge_types = [("A", "to", "B"), ("B", "rev", "A"), ("A", "link", "A")]
    num_nodes = {"A": 12, "B": 10}
    dims = {"A": 16, "B": 24}
    out_dim = 32

    key, ka, kb = jax.random.split(key, 3)
    x_dict = {
        "A": jax.random.normal(ka, (num_nodes["A"], dims["A"]), jnp.float32),
        "B": jax.random.normal(kb, (num_nodes["B"], dims["B"]), jnp.float32),
    }

    edge_index_dict = {}
    n_edges = 20
    for et in edge_types:
        src_t, _, dst_t = et
        key, ks, kd = jax.random.split(key, 3)
        src = jax.random.randint(ks, (n_edges,), 0, num_nodes[src_t])
        dst = jax.random.randint(kd, (n_edges,), 0, num_nodes[dst_t])
        edge_index_dict[et] = jnp.stack([src, dst], axis=0)  # [2, E]

    layer = HeteroGNNLayerPallas(
        dim=dims, out_dim=out_dim, node_types=node_types,
        edge_types=edge_types, aggr="sum", batch_norm=True,
        key=jax.random.PRNGKey(0),
    )

    out = layer(x_dict, edge_index_dict)
    ref = reference_forward(layer, x_dict, edge_index_dict)

    for nt in out:
        jax.block_until_ready(out[nt])
        assert out[nt].shape == (num_nodes[nt], out_dim)
        assert out[nt].dtype == jnp.float32
        err = float(jnp.max(jnp.abs(out[nt] - ref[nt])))
        # bf16 matmul operands with f32 accumulation -> small numerical delta.
        assert err < 0.2, f"max abs err for node type {nt}: {err}"

    print("KERNEL_OK")
</pallas_src>

<mosaic_0001>
module attributes {stable_mosaic.version = 11 : i64} {
  func.func @_linear_kernel(%arg0: i32, %arg1: i32, %arg2: memref<128x128xbf16, #tpu.memory_space<vmem>>, %arg3: memref<128x128xbf16, #tpu.memory_space<vmem>>, %arg4: memref<1x128xf32, #tpu.memory_space<vmem>>, %arg5: memref<128x128xbf16, #tpu.memory_space<vmem>>, %arg6: memref<128x128xf32, #tpu.memory_space<vmem>>) attributes {dimension_semantics = [#tpu.dimension_semantics<parallel>, #tpu.dimension_semantics<arbitrary>], iteration_bounds = array<i64: 1, 1>, scalar_prefetch = 0 : i64, scratch_operands = 1 : i64, tpu.core_type = #tpu.core_type<tc>, window_params = [{transform_indices = @transform_0, window_bounds = array<i64: 128, 128>}, {transform_indices = @transform_1, window_bounds = array<i64: 128, 128>}, {pipeline_mode = #tpu.pipeline_mode<synchronous>, transform_indices = @transform_2, window_bounds = array<i64: 1, 128>}, {transform_indices = @transform_3, window_bounds = array<i64: 128, 128>}]} {
    %c0_i32 = arith.constant 0 : i32
    %0 = arith.cmpi eq, %arg1, %c0_i32 : i32
    %1 = arith.extui %0 : i1 to i32
    %c0_i32_0 = arith.constant 0 : i32
    %2 = arith.cmpi ne, %1, %c0_i32_0 : i32
    scf.if %2 {
      %cst_10 = arith.constant 0.000000e+00 : f32
      %12 = vector.broadcast %cst_10 : f32 to vector<128x128xf32>
      %c0_11 = arith.constant 0 : index
      %c0_12 = arith.constant 0 : index
      %13 = vector.load %arg6[%c0_11, %c0_12] : memref<128x128xf32, #tpu.memory_space<vmem>>, vector<128x128xf32>
      tpu.vector_store %arg6[%c0_11, %c0_12], %12 {strides = array<i32>} : memref<128x128xf32, #tpu.memory_space<vmem>>, vector<128x128xf32>,
    } else {
    }
    %c0 = arith.constant 0 : index
    %c0_1 = arith.constant 0 : index
    %3 = vector.load %arg6[%c0, %c0_1] : memref<128x128xf32, #tpu.memory_space<vmem>>, vector<128x128xf32>
    %c0_2 = arith.constant 0 : index
    %c0_3 = arith.constant 0 : index
    %4 = vector.load %arg2[%c0_2, %c0_3] : memref<128x128xbf16, #tpu.memory_space<vmem>>, vector<128x128xbf16>
    %c0_4 = arith.constant 0 : index
    %c0_5 = arith.constant 0 : index
    %5 = vector.load %arg3[%c0_4, %c0_5] : memref<128x128xbf16, #tpu.memory_space<vmem>>, vector<128x128xbf16>
    %cst = arith.constant dense<0.000000e+00> : vector<128x128xf32>
    %6 = tpu.matmul %4, %5, %cst {dimension_numbers = #tpu.dot_dimension_numbers<[1], [0], [0], [1], [0, 0, 1, 1], [], []>} : vector<128x128xbf16>, vector<128x128xbf16>, vector<128x128xf32> -> vector<128x128xf32>
    %7 = arith.addf %3, %6 : vector<128x128xf32>
    %c0_6 = arith.constant 0 : index
    %c0_7 = arith.constant 0 : index
    %8 = vector.load %arg6[%c0_6, %c0_7] : memref<128x128xf32, #tpu.memory_space<vmem>>, vector<128x128xf32>
    tpu.vector_store %arg6[%c0_6, %c0_7], %7 {strides = array<i32>} : memref<128x128xf32, #tpu.memory_space<vmem>>, vector<128x128xf32>,
    %c0_i32_8 = arith.constant 0 : i32
    %9 = arith.cmpi eq, %arg1, %c0_i32_8 : i32
    %10 = arith.extui %9 : i1 to i32
    %c0_i32_9 = arith.constant 0 : i32
    %11 = arith.cmpi ne, %10, %c0_i32_9 : i32
    scf.if %11 {
      %c0_10 = arith.constant 0 : index
      %c0_11 = arith.constant 0 : index
      %12 = vector.load %arg6[%c0_10, %c0_11] : memref<128x128xf32, #tpu.memory_space<vmem>>, vector<128x128xf32>
      %c0_12 = arith.constant 0 : index
      %c0_13 = arith.constant 0 : index
      %13 = vector.load %arg4[%c0_12, %c0_13] : memref<1x128xf32, #tpu.memory_space<vmem>>, vector<1x128xf32>
      %14 = vector.broadcast %13 : vector<1x128xf32> to vector<128x128xf32>
      %15 = arith.addf %12, %14 : vector<128x128xf32>
      %16 = arith.truncf %15 : vector<128x128xf32> to vector<128x128xbf16>
      %c0_14 = arith.constant 0 : index
      %c0_15 = arith.constant 0 : index
      %17 = vector.load %arg5[%c0_14, %c0_15] : memref<128x128xbf16, #tpu.memory_space<vmem>>, vector<128x128xbf16>
      tpu.vector_store %arg5[%c0_14, %c0_15], %16 {strides = array<i32>} : memref<128x128xbf16, #tpu.memory_space<vmem>>, vector<128x128xbf16>,
    } else {
    }
    return
  }
  func.func @transform_0(%arg0: i32, %arg1: i32) -> (i32, i32) {
    %c0_i32 = arith.constant 0 : i32
    return %arg0, %arg1 : i32, i32
  }
  func.func @transform_1(%arg0: i32, %arg1: i32) -> (i32, i32) {
    %c0_i32 = arith.constant 0 : i32
    %c0_i32_0 = arith.constant 0 : i32
    return %arg1, %c0_i32 : i32, i32
  }
  func.func @transform_2(%arg0: i32, %arg1: i32) -> (i32, i32) {
    %c0_i32 = arith.constant 0 : i32
    %c0_i32_0 = arith.constant 0 : i32
    %c0_i32_1 = arith.constant 0 : i32
    return %c0_i32, %c0_i32_0 : i32, i32
  }
  func.func @transform_3(%arg0: i32, %arg1: i32) -> (i32, i32) {
    %c0_i32 = arith.constant 0 : i32
    %c0_i32_0 = arith.constant 0 : i32
    return %arg0, %c0_i32 : i32, i32
  }
}

</mosaic_0001>

<bundles_post_ra>
// kernel: tpu_custom_call.1
= control target key start
LH: loop header
LB: loop body
LE: loop exit
PB: predicated region body
PF: predicated region fallthrough
CT: control target
= control target key end

     0   :  { %8 = vsyncpa [#allocation4], 0  ;;  %s803_s0 = inlined_call_operand.hbm [shape: bf16[128,128], index: 0, kind: input, shape index: {}]   ;;  %s804_s1 = inlined_call_operand.hbm [shape: bf16[128,128], index: 1, kind: input, shape index: {}]   ;;  %s805_s2 = inlined_call_operand.vmem [shape: f32[1,128], index: 2, kind: input, shape index: {}]   ;;  %s806_s3 = inlined_call_operand.hbm [shape: bf16[128,128], index: 3, kind: output, shape index: {}]  }
   0x1   :  { %9 = vsyncpa [#allocation7], 0 }
   0x2   :  { %10 = vsyncpa [#allocation5], 0  ;;  %s730_s12 = smov [#allocation3]   ;;  %s658_s16 = scalar_lea.hbm %s803_s0, 1024 }
   0x3   :  { %s16_s13 = sshll.u32 %s730_s12, 4  ;;  %p659_p0 = scmp.ne.s32.totalorder %s803_s0, %s658_s16  ;;  %s17_s13 = int_to_ptr.vmem [resolvable:$true] %s16_s13 }
   0x4   :  { %p662_p1 = scmp.lt.u32.totalorder %s658_s16, %s803_s0 }
   0x6   :  { %p664_p2 = pnand %p662_p1, %p659_p0 }
   0x8   :  { %667 = shalt.err (!%p664_p2)
}
   0x9   :  { %s668_s21 = scalar_lea.vmem %s17_s13, 1024  ;;  %p673_p4 = scmp.lt.s32.totalorder %s17_s13, %s17_s13 }
   0xa   :  { %p669_p3 = scmp.ne.s32.totalorder %s17_s13, %s668_s21  ;;  %p674_p5 = scmp.lt.s32.totalorder %s668_s21, %s668_s21 }
   0xc   :  { %p675_p6 = por %p674_p5, %p673_p4 }
   0xe   :  { %p676_p7 = pnand %p675_p6, %p669_p3 }
  0x10   :  { %679 = shalt.err (!%p676_p7)
}
  0x11   :  { %s731_s22 = smov 64   ;;  %s732_s23 = smov 4  }
  0x12   :  { %22 = dma.hbm_to_vmem [thread:$0]  %s803_s0, 1024, %s17_s13, [#allocation4], %s731_s22, %s731_s22, %s732_s23  }
  0x13   :  { %s733_s26 = smov [#allocation6]   ;;  %s680_s30 = scalar_lea.hbm %s804_s1, 1024 }
  0x14   :  { %s28_s27 = sshll.u32 %s733_s26, 4  ;;  %p681_p8 = scmp.ne.s32.totalorder %s804_s1, %s680_s30  ;;  %s29_s27 = int_to_ptr.vmem [resolvable:$true] %s28_s27 }
  0x15   :  { %p684_p9 = scmp.lt.u32.totalorder %s680_s30, %s804_s1 }
  0x17   :  { %p686_p10 = pnand %p684_p9, %p681_p8 }
  0x19   :  { %689 = shalt.err (!%p686_p10)
}
  0x1a   :  { %s690_s8 = scalar_lea.vmem %s29_s27, 1024  ;;  %p695_p12 = scmp.lt.s32.totalorder %s29_s27, %s29_s27 }
  0x1b   :  { %p691_p11 = scmp.ne.s32.totalorder %s29_s27, %s690_s8  ;;  %p696_p13 = scmp.lt.s32.totalorder %s690_s8, %s690_s8 }
  0x1d   :  { %p697_p0 = por %p696_p13, %p695_p12 }
  0x1f   :  { %p698_p1 = pnand %p697_p0, %p691_p11 }
  0x21   :  { %701 = shalt.err (!%p698_p1)
}
  0x22   :  { %34 = dma.hbm_to_vmem [thread:$0]  %s804_s1, 1024, %s29_s27, [#allocation7], %s731_s22, %s731_s22, %s732_s23  }
  0x23   :  { %724 = dma.done.wait [#allocation4], 1024  }
  0x24   :  { %725 = vsyncadd [#allocation4], 4294966272 }
  0x25   :  { %726 = dma.done.wait [#allocation7], 1024  }
  0x26   :  { %727 = vsyncadd [#allocation7], 4294966272  ;;  %v642_v0 = vld [vmem:[#allocation6] sm:$0xff]   ;;  %v643_v1 = vld [vmem:[#allocation6 + $0x8] sm:$0xff]  }
  0x27   :  { %589 = vmatprep.subr.bf16.mxu0 %v642_v0  ;;  %621 = vmatprep.subr.bf16.mxu1 %v642_v0  ;;  %v644_v2 = vld [vmem:[#allocation6 + $0x10] sm:$0xff]   ;;  %v645_v3 = vld [vmem:[#allocation6 + $0x18] sm:$0xff]   ;;  %v650_v4 = vld [vmem:[#allocation3] sm:$0xff]  }
  0x28   :  { %590 = vmatpush3.bf16.msra.mxu0 %v642_v0  ;;  %629 = vmatpush3.bf16.msra.mxu1 %v642_v0  ;;  %v651_v5 = vld [vmem:[#allocation3 + $0x20] sm:$0xff]   ;;  %v647_v7 = vld [vmem:[#allocation6 + $0x28] sm:$0xff]   ;;  %v648_v8 = vld [vmem:[#allocation6 + $0x30] sm:$0xff]  }
  0x29   :  { %591 = vmatprep.subr.bf16.mxu0 %v643_v1  ;;  %622 = vmatprep.subr.bf16.mxu1 %v643_v1  ;;  %v646_v6 = vld [vmem:[#allocation6 + $0x20] sm:$0xff]   ;;  %v649_v9 = vld [vmem:[#allocation6 + $0x38] sm:$0xff]   ;;  %v652_v10 = vld [vmem:[#allocation3 + $0x8] sm:$0xff]  }
  0x2a   :  { %605 = vmatprep.mubr.bf16.mxu0 %v650_v4  ;;  %613 = vmatprep.mubr.bf16.mxu1 %v651_v5  ;;  %v653_v11 = vld [vmem:[#allocation3 + $0x28] sm:$0xff]   ;;  %v654_v12 = vld [vmem:[#allocation3 + $0x10] sm:$0xff]   ;;  %v656_v14 = vld [vmem:[#allocation3 + $0x18] sm:$0xff]  }
  0x2b   :  { %v655_v13 = vld [vmem:[#allocation3 + $0x30] sm:$0xff]   ;;  %v657_v15 = vld [vmem:[#allocation3 + $0x38] sm:$0xff]   ;;  %v493_v17 = vld [vmem:[%s805_s2] ss:$0 sm:$0xff]  ;;  %s734_s2 = smov [#allocation8]  }
  0x2c   :  { %592 = vmatpush3.bf16.msra.mxu0 %v643_v1  ;;  %630 = vmatpush3.bf16.msra.mxu1 %v643_v1  ;;  %s464_s11 = sshll.u32 %s734_s2, 4  ;;  %s465_s11 = int_to_ptr.vmem [resolvable:$true] %s464_s11 }
  0x2d   :  { %593 = vmatprep.subr.bf16.mxu0 %v644_v2  ;;  %623 = vmatprep.subr.bf16.mxu1 %v644_v2  ;;  %s702_s12 = scalar_lea.vmem %s465_s11, 1024  ;;  %p707_p3 = scmp.lt.s32.totalorder %s465_s11, %s465_s11 }
  0x2e   :  { %p703_p2 = scmp.ne.s32.totalorder %s465_s11, %s702_s12  ;;  %p708_p4 = scmp.lt.s32.totalorder %s702_s12, %s702_s12 }
  0x30   :  { %594 = vmatpush3.bf16.msra.mxu0 %v644_v2  ;;  %631 = vmatpush3.bf16.msra.mxu1 %v644_v2  ;;  %p709_p5 = por %p708_p4, %p707_p3 }
  0x31   :  { %595 = vmatprep.subr.bf16.mxu0 %v645_v3  ;;  %624 = vmatprep.subr.bf16.mxu1 %v645_v3 }
  0x32   :  { %p710_p6 = pnand %p709_p5, %p703_p2 }
  0x34   :  { %596 = vmatpush3.bf16.msra.mxu0 %v645_v3  ;;  %632 = vmatpush3.bf16.msra.mxu1 %v645_v3 }
  0x35   :  { %597 = vmatprep.subr.bf16.mxu0 %v646_v6  ;;  %625 = vmatprep.subr.bf16.mxu1 %v646_v6 }
  0x38   :  { %598 = vmatpush3.bf16.msra.mxu0 %v646_v6  ;;  %633 = vmatpush3.bf16.msra.mxu1 %v646_v6 }
  0x39   :  { %599 = vmatprep.subr.bf16.mxu0 %v647_v7  ;;  %626 = vmatprep.subr.bf16.mxu1 %v647_v7 }
  0x3c   :  { %600 = vmatpush3.bf16.msra.mxu0 %v647_v7  ;;  %634 = vmatpush3.bf16.msra.mxu1 %v647_v7 }
  0x3d   :  { %601 = vmatprep.subr.bf16.mxu0 %v648_v8  ;;  %627 = vmatprep.subr.bf16.mxu1 %v648_v8 }
  0x40   :  { %602 = vmatpush3.bf16.msra.mxu0 %v648_v8  ;;  %635 = vmatpush3.bf16.msra.mxu1 %v648_v8 }
  0x41   :  { %603 = vmatprep.subr.bf16.mxu0 %v649_v9  ;;  %628 = vmatprep.subr.bf16.mxu1 %v649_v9 }
  0x44   :  { %604 = vmatpush3.bf16.msra.mxu0 %v649_v9  ;;  %636 = vmatpush3.bf16.msra.mxu1 %v649_v9 }
  0x47   :  { %606 = vmatmul.mubr.bf16.vlgmr.msra.gmra.mrb[0].mxu0 %v652_v10  ;;  %614 = vmatmul.mubr.bf16.vlgmr.msra.gmra.mrb[0].mxu1 %v653_v11 }
  0x48   :  { %609 = vmatprep.mubr.bf16.mxu0 %v654_v12  ;;  %617 = vmatprep.mubr.bf16.mxu1 %v655_v13 }
  0x4f   :  { %610 = vmatmul.mubr.bf16.gmra.mrb[4].mxu0 %v656_v14  ;;  %618 = vmatmul.mubr.bf16.gmra.mrb[4].mxu1 %v657_v15 }
 0x11a   :  { %v607_v16 = vpop.f32.mrb[0].mxu0  ;;  %v615_v18 = vpop.f32.mrb[0].mxu1 }
 0x11b   :  { %v242_v19 = vpop.f32.mrb[1].mxu0  ;;  %v274_v20 = vpop.f32.mrb[1].mxu1  ;;  %v365_v23 = vadd.f32 %v607_v16, %v493_v17  ;;  %v373_v24 = vadd.f32 %v615_v18, %v493_v17 }
 0x11c   :  { %v608_v21 = vpop.f32.mrb[2].mxu0  ;;  %v616_v22 = vpop.f32.mrb[2].mxu1  ;;  %v363_v29 = vadd.f32 %v493_v17, %v242_v19  ;;  %v371_v30 = vadd.f32 %v493_v17, %v274_v20 }
 0x11d   :  { %v366_v25 = vadd.f32 %v608_v21, %v493_v17  ;;  %v374_v26 = vadd.f32 %v616_v22, %v493_v17  ;;  %v245_v27 = vpop.f32.mrb[3].mxu0  ;;  %v277_v28 = vpop.f32.mrb[3].mxu1 }
 0x11e   :  { %v364_v31 = vadd.f32 %v493_v17, %v245_v27  ;;  %v372_v32 = vadd.f32 %v493_v17, %v277_v28 }
 0x11f   :  { %v534_v33 = vpack.c.bf16 %v366_v25, %v365_v23  ;;  %v554_v34 = vpack.c.bf16 %v374_v26, %v373_v24 }
 0x120   :  { %v529_v35 = vpack.c.bf16 %v364_v31, %v363_v29  ;;  %v549_v36 = vpack.c.bf16 %v372_v32, %v371_v30 }
 0x121   :  { %566 = vst [vmem:[#allocation8 + $0x8] sm:$0xff] %v534_v33   ;;  %570 = vst [vmem:[#allocation8 + $0x28] sm:$0xff] %v554_v34  }
 0x122   :  { %530 = vst [vmem:[#allocation8] sm:$0xff] %v529_v35   ;;  %569 = vst [vmem:[#allocation8 + $0x20] sm:$0xff] %v549_v36   ;;  %v611_v37 = vpop.f32.mrb[4].mxu0  ;;  %v619_v38 = vpop.f32.mrb[4].mxu1 }
 0x123   :  { %v258_v39 = vpop.f32.mrb[5].mxu0  ;;  %v290_v40 = vpop.f32.mrb[5].mxu1  ;;  %v369_v43 = vadd.f32 %v611_v37, %v493_v17  ;;  %v377_v44 = vadd.f32 %v619_v38, %v493_v17 }
 0x124   :  { %v612_v41 = vpop.f32.mrb[6].mxu0  ;;  %v620_v42 = vpop.f32.mrb[6].mxu1  ;;  %v367_v49 = vadd.f32 %v493_v17, %v258_v39  ;;  %v375_v50 = vadd.f32 %v493_v17, %v290_v40 }
 0x125   :  { %v370_v45 = vadd.f32 %v612_v41, %v493_v17  ;;  %v378_v46 = vadd.f32 %v620_v42, %v493_v17  ;;  %v261_v47 = vpop.f32.mrb[7].mxu0  ;;  %v293_v48 = vpop.f32.mrb[7].mxu1 }
 0x126   :  { %v368_v51 = vadd.f32 %v493_v17, %v261_v47  ;;  %v376_v52 = vadd.f32 %v493_v17, %v293_v48 }
 0x127   :  { %v544_v53 = vpack.c.bf16 %v370_v45, %v369_v43  ;;  %v564_v54 = vpack.c.bf16 %v378_v46, %v377_v44 }
 0x128   :  { %v539_v55 = vpack.c.bf16 %v368_v51, %v367_v49  ;;  %v559_v56 = vpack.c.bf16 %v376_v52, %v375_v50 }
 0x129   :  { %568 = vst [vmem:[#allocation8 + $0x18] sm:$0xff] %v544_v53   ;;  %572 = vst [vmem:[#allocation8 + $0x38] sm:$0xff] %v564_v54  }
 0x12a   :  { %567 = vst [vmem:[#allocation8 + $0x10] sm:$0xff] %v539_v55   ;;  %571 = vst [vmem:[#allocation8 + $0x30] sm:$0xff] %v559_v56  }
 0x12b   :  { %713 = shalt.err (!%p710_p6)
}
 0x12c   :  { %s714_s15 = scalar_lea.hbm %s806_s3, 1024 }
 0x12d   :  { %p715_p7 = scmp.ne.s32.totalorder %s806_s3, %s714_s15  ;;  %p718_p8 = scmp.lt.u32.totalorder %s714_s15, %s806_s3 }
 0x12f   :  { %p720_p9 = pnand %p718_p8, %p715_p7 }
 0x131   :  { %723 = shalt.err (!%p720_p9)
}
 0x132   :  { %470 = dma.vmem_to_hbm [thread:$0]  %s465_s11, 1024, %s806_s3, [#allocation5], %s731_s22, %s731_s22, %s732_s23  }
 0x133   :  { %728 = dma.done.wait [#allocation5], 1024  }
 0x134   :  { %729 = vsyncadd [#allocation5], 4294966272 }
 0x135   :  { %474 = vsyncpa [#allocation4], 1 }
 0x136   :  { %475 = vsyncpa [#allocation7], 1 }
 0x137   :  { %476 = vsyncpa [#allocation5], 1 }

</bundles_post_ra>
